<compile_context>
chip_gen: v7x
topology: tpu7x:2x2x1
jax: 0.10.0
libtpu: 0.0.40
codegen_flags: <defaults>
</compile_context>

<pallas_src>
import functools

import jax
import jax.numpy as jnp
from jax import lax
from jax.experimental import pallas as pl
from jax.experimental.pallas import tpu as pltpu

EPS = 1e-5
F32 = jnp.float32


def _batchnorm_train(y, gamma_t, beta_t, gsel, inv_cnt):
    """BatchNorm2d (training batch stats) on lane-dense (N*H, W*C) activations.

    gamma_t / beta_t: affine params tiled over x -> (1, W*C).
    gsel: (W*C, W*C) channel-grouping matrix, gsel[(x,c),(x',c')] = [c == c'],
    so row_sums @ gsel yields per-channel totals already re-tiled over x.
    """
    row_sum = jnp.sum(y, axis=0, keepdims=True)          # (1, W*C)
    row_ssq = jnp.sum(y * y, axis=0, keepdims=True)      # (1, W*C)
    chan_sum = jnp.dot(row_sum, gsel, preferred_element_type=F32)
    chan_ssq = jnp.dot(row_ssq, gsel, preferred_element_type=F32)
    mean = chan_sum * inv_cnt
    var = chan_ssq * inv_cnt - mean * mean               # biased variance
    scale = gamma_t * lax.rsqrt(var + EPS)               # fused affine:
    shift = beta_t - mean * scale                        #   y * scale + shift
    return y * scale + shift


def _unet_block_kernel(x_ref, band1_ref, band2_ref,
                       b1_ref, g1_ref, be1_ref,
                       b2_ref, g2_ref, be2_ref,
                       gsel_ref, out_ref, pad1_ref, pad2_ref, *, inv_cnt):
    N, H, WCin = x_ref.shape
    WCout = out_ref.shape[-1]
    NH = N * H
    gsel = gsel_ref[...]

    # -------------------- conv1 (3x3, pad=1) + bias + ReLU --------------------
    x3 = x_ref[...]                                      # (N, H, W*Cin)
    zrow1 = jnp.zeros((N, 1, WCin), F32)
    pad1_ref[:, 0:1, :] = zrow1                          # zero only the 1-row halo
    pad1_ref[:, H + 1:H + 2, :] = zrow1
    pad1_ref[:, 1:H + 1, :] = x3

    up = pad1_ref[:, 0:H, :].reshape(NH, WCin)           # input row y-1
    mid = x3.reshape(NH, WCin)                           # input row y
    down = pad1_ref[:, 2:H + 2, :].reshape(NH, WCin)     # input row y+1

    acc = jnp.dot(up, band1_ref[0], preferred_element_type=F32)
    acc = acc + jnp.dot(mid, band1_ref[1], preferred_element_type=F32)
    acc = acc + jnp.dot(down, band1_ref[2], preferred_element_type=F32)
    y1 = jnp.maximum(acc + b1_ref[...], 0.0)             # (N*H, W*Cout)

    bn1 = _batchnorm_train(y1, g1_ref[...], be1_ref[...], gsel, inv_cnt)

    # -------------------- conv2 (3x3, pad=1) + bias + ReLU --------------------
    zrow2 = jnp.zeros((N, 1, WCout), F32)
    pad2_ref[:, 0:1, :] = zrow2
    pad2_ref[:, H + 1:H + 2, :] = zrow2
    pad2_ref[:, 1:H + 1, :] = bn1.reshape(N, H, WCout)

    up2 = pad2_ref[:, 0:H, :].reshape(NH, WCout)
    down2 = pad2_ref[:, 2:H + 2, :].reshape(NH, WCout)

    acc2 = jnp.dot(up2, band2_ref[0], preferred_element_type=F32)
    acc2 = acc2 + jnp.dot(bn1, band2_ref[1], preferred_element_type=F32)
    acc2 = acc2 + jnp.dot(down2, band2_ref[2], preferred_element_type=F32)
    y2 = jnp.maximum(acc2 + b2_ref[...], 0.0)

    out_ref[...] = _batchnorm_train(y2, g2_ref[...], be2_ref[...], gsel, inv_cnt)


def _band_weights(w, W):
    """torch conv weight (Cout, Cin, 3, 3) -> (3, W*Cin, W*Cout) banded matmuls.

    band[dy][(xi, ci), (x, co)] = w[co, ci, dy, xi - x + 1] (0 outside the band),
    so a row-shifted (N*H, W*Cin) activation slab @ band[dy] performs all three
    column taps of kernel row dy, including the width zero-padding.
    """
    Cout, Cin, KH, KW = w.shape
    wk = jnp.transpose(w, (2, 3, 1, 0)).astype(F32)           # (dy, kx, ci, co)
    # S[kx, xi, x] = 1 iff xi == x + kx - 1
    S = jnp.stack([jnp.eye(W, W, 1 - kx, dtype=F32) for kx in range(KW)])
    band = jnp.einsum('kix,dkcf->dicxf', S, wk)               # (dy, xi, ci, x, co)
    return band.reshape(KH, W * Cin, W * Cout)


def unet_block(x_nchw, params):
    """Pallas implementation of UNetBlock.forward (NCHW in / NCHW out, f32)."""
    (w1, b1, g1, be1, w2, b2, g2, be2) = params
    N, Cin, H, W = x_nchw.shape
    Cout = w1.shape[0]
    WCin, WCout = W * Cin, W * Cout
    NH = N * H

    # NCHW -> lane-dense (N, H, W*Cin); no spatial pre-padding in HBM.
    x3 = jnp.transpose(x_nchw, (0, 2, 3, 1)).reshape(N, H, WCin).astype(F32)

    band1 = _band_weights(w1, W)                              # (3, W*Cin,  W*Cout)
    band2 = _band_weights(w2, W)                              # (3, W*Cout, W*Cout)
    gsel = jnp.tile(jnp.eye(Cout, dtype=F32), (W, W))         # (W*Cout, W*Cout)
    tile_c = lambda v: jnp.tile(v.astype(F32).reshape(1, Cout), (1, W))

    kernel = functools.partial(_unet_block_kernel, inv_cnt=1.0 / (N * H * W))
    vmem = pl.BlockSpec(memory_space=pltpu.MemorySpace.VMEM)

    out2d = pl.pallas_call(
        kernel,
        out_shape=jax.ShapeDtypeStruct((NH, WCout), F32),     # lane-dense output
        in_specs=[vmem] * 10,
        out_specs=vmem,
        scratch_shapes=[pltpu.VMEM((N, H + 2, WCin), F32),    # 1-row halo scratch
                        pltpu.VMEM((N, H + 2, WCout), F32)],
        compiler_params=pltpu.CompilerParams(
            vmem_limit_bytes=64 * 1024 * 1024),
    )(x3, band1, band2,
      tile_c(b1), tile_c(g1), tile_c(be1),
      tile_c(b2), tile_c(g2), tile_c(be2), gsel)

    return jnp.transpose(out2d.reshape(N, H, W, Cout), (0, 3, 1, 2))


# ----------------------------- pure-JAX reference -----------------------------
def _conv_bn_ref(x, w, b, g, be):
    y = lax.conv_general_dilated(
        x, w, window_strides=(1, 1), padding='SAME',
        dimension_numbers=('NCHW', 'OIHW', 'NCHW'),
        precision=lax.Precision.HIGHEST)
    y = y + b[None, :, None, None]
    y = jnp.maximum(y, 0.0)
    mean = jnp.mean(y, axis=(0, 2, 3), keepdims=True)
    var = jnp.mean((y - mean) ** 2, axis=(0, 2, 3), keepdims=True)
    return ((y - mean) * lax.rsqrt(var + EPS) * g[None, :, None, None]
            + be[None, :, None, None])


def unet_block_ref(x, params):
    (w1, b1, g1, be1, w2, b2, g2, be2) = params
    y = _conv_bn_ref(x, w1, b1, g1, be1)
    return _conv_bn_ref(y, w2, b2, g2, be2)


if __name__ == "__main__":
    N, Cin, Cout, H, W = 2, 4, 8, 16, 16

    key = jax.random.PRNGKey(0)
    ks = jax.random.split(key, 9)
    x = jax.random.normal(ks[0], (N, Cin, H, W), F32)

    # deterministic synthetic parameters (shapes from the module's __init__)
    w1 = 0.2 * jax.random.normal(ks[1], (Cout, Cin, 3, 3), F32)
    b1 = 0.1 * jax.random.normal(ks[2], (Cout,), F32)
    g1 = 1.0 + 0.1 * jax.random.normal(ks[3], (Cout,), F32)
    be1 = 0.1 * jax.random.normal(ks[4], (Cout,), F32)
    w2 = 0.2 * jax.random.normal(ks[5], (Cout, Cout, 3, 3), F32)
    b2 = 0.1 * jax.random.normal(ks[6], (Cout,), F32)
    g2 = 1.0 + 0.1 * jax.random.normal(ks[7], (Cout,), F32)
    be2 = 0.1 * jax.random.normal(ks[8], (Cout,), F32)
    params = (w1, b1, g1, be1, w2, b2, g2, be2)

    out = jax.block_until_ready(unet_block(x, params))
    ref = jax.block_until_ready(unet_block_ref(x, params))

    assert out.shape == (N, Cout, H, W), out.shape
    # Kernel matmuls run at DEFAULT precision (bf16 MXU passes, f32 accumulate)
    # per the perf review; compare against the HIGHEST-precision reference with
    # a correspondingly looser bound.
    err = float(jnp.max(jnp.abs(out - ref)))
    assert err < 5e-2, f"max abs error {err}"

    print("KERNEL_OK")
</pallas_src>

<mosaic_0001>
module attributes {stable_mosaic.version = 11 : i64} {
  func.func @_unet_block_kernel(%arg0: memref<2x16x64xf32, #tpu.memory_space<vmem>>, %arg1: memref<3x64x128xf32, #tpu.memory_space<vmem>>, %arg2: memref<3x128x128xf32, #tpu.memory_space<vmem>>, %arg3: memref<1x128xf32, #tpu.memory_space<vmem>>, %arg4: memref<1x128xf32, #tpu.memory_space<vmem>>, %arg5: memref<1x128xf32, #tpu.memory_space<vmem>>, %arg6: memref<1x128xf32, #tpu.memory_space<vmem>>, %arg7: memref<1x128xf32, #tpu.memory_space<vmem>>, %arg8: memref<1x128xf32, #tpu.memory_space<vmem>>, %arg9: memref<128x128xf32, #tpu.memory_space<vmem>>, %arg10: memref<32x128xf32, #tpu.memory_space<vmem>>, %arg11: memref<2x18x64xf32, #tpu.memory_space<vmem>>, %arg12: memref<2x18x128xf32, #tpu.memory_space<vmem>>) attributes {dimension_semantics = [], scalar_prefetch = 0 : i64, scratch_operands = 2 : i64, tpu.core_type = #tpu.core_type<tc>} {
    %c0 = arith.constant 0 : index
    %c0_0 = arith.constant 0 : index
    %0 = vector.load %arg9[%c0, %c0_0] : memref<128x128xf32, #tpu.memory_space<vmem>>, vector<128x128xf32>
    %c0_1 = arith.constant 0 : index
    %c0_2 = arith.constant 0 : index
    %c0_3 = arith.constant 0 : index
    %1 = vector.load %arg0[%c0_1, %c0_2, %c0_3] : memref<2x16x64xf32, #tpu.memory_space<vmem>>, vector<2x16x64xf32>
    %cst = arith.constant 0.000000e+00 : f32
    %2 = vector.broadcast %cst : f32 to vector<2x1x64xf32>
    %c0_4 = arith.constant 0 : index
    %c0_5 = arith.constant 0 : index
    %c0_6 = arith.constant 0 : index
    %3 = vector.load %arg11[%c0_4, %c0_5, %c0_6] : memref<2x18x64xf32, #tpu.memory_space<vmem>>, vector<2x1x64xf32>
    tpu.vector_store %arg11[%c0_4, %c0_5, %c0_6], %2 {strides = array<i32>} : memref<2x18x64xf32, #tpu.memory_space<vmem>>, vector<2x1x64xf32>,
    %c0_7 = arith.constant 0 : index
    %c17 = arith.constant 17 : index
    %c0_8 = arith.constant 0 : index
    %4 = vector.load %arg11[%c0_7, %c17, %c0_8] : memref<2x18x64xf32, #tpu.memory_space<vmem>>, vector<2x1x64xf32>
    tpu.vector_store %arg11[%c0_7, %c17, %c0_8], %2 {strides = array<i32>} : memref<2x18x64xf32, #tpu.memory_space<vmem>>, vector<2x1x64xf32>,
    %c0_9 = arith.constant 0 : index
    %c1 = arith.constant 1 : index
    %c0_10 = arith.constant 0 : index
    %5 = vector.load %arg11[%c0_9, %c1, %c0_10] : memref<2x18x64xf32, #tpu.memory_space<vmem>>, vector<2x16x64xf32>
    tpu.vector_store %arg11[%c0_9, %c1, %c0_10], %1 {strides = array<i32>} : memref<2x18x64xf32, #tpu.memory_space<vmem>>, vector<2x16x64xf32>,
    %c0_11 = arith.constant 0 : index
    %c0_12 = arith.constant 0 : index
    %c0_13 = arith.constant 0 : index
    %6 = vector.load %arg11[%c0_11, %c0_12, %c0_13] : memref<2x18x64xf32, #tpu.memory_space<vmem>>, vector<2x16x64xf32>
    %7 = vector.shape_cast %6 : vector<2x16x64xf32> to vector<32x64xf32>
    %8 = vector.shape_cast %1 : vector<2x16x64xf32> to vector<32x64xf32>
    %c0_14 = arith.constant 0 : index
    %c2 = arith.constant 2 : index
    %c0_15 = arith.constant 0 : index
    %9 = vector.load %arg11[%c0_14, %c2, %c0_15] : memref<2x18x64xf32, #tpu.memory_space<vmem>>, vector<2x16x64xf32>
    %10 = vector.shape_cast %9 : vector<2x16x64xf32> to vector<32x64xf32>
    %c0_16 = arith.constant 0 : index
    %c0_17 = arith.constant 0 : index
    %c0_18 = arith.constant 0 : index
    %11 = vector.load %arg1[%c0_16, %c0_17, %c0_18] : memref<3x64x128xf32, #tpu.memory_space<vmem>>, vector<1x64x128xf32>
    %12 = vector.shape_cast %11 : vector<1x64x128xf32> to vector<64x128xf32>
    %cst_19 = arith.constant dense<0.000000e+00> : vector<32x128xf32>
    %13 = tpu.matmul %7, %12, %cst_19 {dimension_numbers = #tpu.dot_dimension_numbers<[1], [0], [0], [1], [0, 0, 1, 1], [], []>} : vector<32x64xf32>, vector<64x128xf32>, vector<32x128xf32> -> vector<32x128xf32>
    %c1_20 = arith.constant 1 : index
    %c0_21 = arith.constant 0 : index
    %c0_22 = arith.constant 0 : index
    %14 = vector.load %arg1[%c1_20, %c0_21, %c0_22] : memref<3x64x128xf32, #tpu.memory_space<vmem>>, vector<1x64x128xf32>
    %15 = vector.shape_cast %14 : vector<1x64x128xf32> to vector<64x128xf32>
    %cst_23 = arith.constant dense<0.000000e+00> : vector<32x128xf32>
    %16 = tpu.matmul %8, %15, %cst_23 {dimension_numbers = #tpu.dot_dimension_numbers<[1], [0], [0], [1], [0, 0, 1, 1], [], []>} : vector<32x64xf32>, vector<64x128xf32>, vector<32x128xf32> -> vector<32x128xf32>
    %17 = arith.addf %13, %16 : vector<32x128xf32>
    %c2_24 = arith.constant 2 : index
    %c0_25 = arith.constant 0 : index
    %c0_26 = arith.constant 0 : index
    %18 = vector.load %arg1[%c2_24, %c0_25, %c0_26] : memref<3x64x128xf32, #tpu.memory_space<vmem>>, vector<1x64x128xf32>
    %19 = vector.shape_cast %18 : vector<1x64x128xf32> to vector<64x128xf32>
    %cst_27 = arith.constant dense<0.000000e+00> : vector<32x128xf32>
    %20 = tpu.matmul %10, %19, %cst_27 {dimension_numbers = #tpu.dot_dimension_numbers<[1], [0], [0], [1], [0, 0, 1, 1], [], []>} : vector<32x64xf32>, vector<64x128xf32>, vector<32x128xf32> -> vector<32x128xf32>
    %21 = arith.addf %17, %20 : vector<32x128xf32>
    %c0_28 = arith.constant 0 : index
    %c0_29 = arith.constant 0 : index
    %22 = vector.load %arg3[%c0_28, %c0_29] : memref<1x128xf32, #tpu.memory_space<vmem>>, vector<1x128xf32>
    %23 = vector.broadcast %22 : vector<1x128xf32> to vector<32x128xf32>
    %24 = arith.addf %21, %23 : vector<32x128xf32>
    %cst_30 = arith.constant 0.000000e+00 : f32
    %25 = vector.broadcast %cst_30 : f32 to vector<32x128xf32>
    %26 = arith.maximumf %24, %25 : vector<32x128xf32>
    %c0_31 = arith.constant 0 : index
    %c0_32 = arith.constant 0 : index
    %27 = vector.load %arg4[%c0_31, %c0_32] : memref<1x128xf32, #tpu.memory_space<vmem>>, vector<1x128xf32>
    %c0_33 = arith.constant 0 : index
    %c0_34 = arith.constant 0 : index
    %28 = vector.load %arg5[%c0_33, %c0_34] : memref<1x128xf32, #tpu.memory_space<vmem>>, vector<1x128xf32>
    %cst_35 = arith.constant dense<0.000000e+00> : vector<128xf32>
    %29 = vector.multi_reduction <add>, %26, %cst_35 [0] : vector<32x128xf32> to vector<128xf32>
    %30 = vector.shape_cast %29 : vector<128xf32> to vector<1x128xf32>
    %31 = arith.mulf %26, %26 : vector<32x128xf32>
    %cst_36 = arith.constant dense<0.000000e+00> : vector<128xf32>
    %32 = vector.multi_reduction <add>, %31, %cst_36 [0] : vector<32x128xf32> to vector<128xf32>
    %33 = vector.shape_cast %32 : vector<128xf32> to vector<1x128xf32>
    %cst_37 = arith.constant dense<0.000000e+00> : vector<1x128xf32>
    %34 = tpu.matmul %30, %0, %cst_37 {dimension_numbers = #tpu.dot_dimension_numbers<[1], [0], [0], [1], [0, 0, 1, 1], [], []>} : vector<1x128xf32>, vector<128x128xf32>, vector<1x128xf32> -> vector<1x128xf32>
    %cst_38 = arith.constant dense<0.000000e+00> : vector<1x128xf32>
    %35 = tpu.matmul %33, %0, %cst_38 {dimension_numbers = #tpu.dot_dimension_numbers<[1], [0], [0], [1], [0, 0, 1, 1], [], []>} : vector<1x128xf32>, vector<128x128xf32>, vector<1x128xf32> -> vector<1x128xf32>
    %cst_39 = arith.constant 0.001953125 : f32
    %36 = vector.broadcast %cst_39 : f32 to vector<1x128xf32>
    %37 = arith.mulf %34, %36 : vector<1x128xf32>
    %cst_40 = arith.constant 0.001953125 : f32
    %38 = vector.broadcast %cst_40 : f32 to vector<1x128xf32>
    %39 = arith.mulf %35, %38 : vector<1x128xf32>
    %40 = arith.mulf %37, %37 : vector<1x128xf32>
    %41 = arith.subf %39, %40 : vector<1x128xf32>
    %cst_41 = arith.constant 9.99999974E-6 : f32
    %42 = vector.broadcast %cst_41 : f32 to vector<1x128xf32>
    %43 = arith.addf %41, %42 : vector<1x128xf32>
    %44 = math.rsqrt %43 : vector<1x128xf32>
    %45 = arith.mulf %27, %44 : vector<1x128xf32>
    %46 = arith.mulf %37, %45 : vector<1x128xf32>
    %47 = arith.subf %28, %46 : vector<1x128xf32>
    %48 = vector.broadcast %45 : vector<1x128xf32> to vector<32x128xf32>
    %49 = arith.mulf %26, %48 : vector<32x128xf32>
    %50 = vector.broadcast %47 : vector<1x128xf32> to vector<32x128xf32>
    %51 = arith.addf %49, %50 : vector<32x128xf32>
    %cst_42 = arith.constant 0.000000e+00 : f32
    %52 = vector.broadcast %cst_42 : f32 to vector<2x1x128xf32>
    %c0_43 = arith.constant 0 : index
    %c0_44 = arith.constant 0 : index
    %c0_45 = arith.constant 0 : index
    %53 = vector.load %arg12[%c0_43, %c0_44, %c0_45] : memref<2x18x128xf32, #tpu.memory_space<vmem>>, vector<2x1x128xf32>
    tpu.vector_store %arg12[%c0_43, %c0_44, %c0_45], %52 {strides = array<i32>} : memref<2x18x128xf32, #tpu.memory_space<vmem>>, vector<2x1x128xf32>,
    %c0_46 = arith.constant 0 : index
    %c17_47 = arith.constant 17 : index
    %c0_48 = arith.constant 0 : index
    %54 = vector.load %arg12[%c0_46, %c17_47, %c0_48] : memref<2x18x128xf32, #tpu.memory_space<vmem>>, vector<2x1x128xf32>
    tpu.vector_store %arg12[%c0_46, %c17_47, %c0_48], %52 {strides = array<i32>} : memref<2x18x128xf32, #tpu.memory_space<vmem>>, vector<2x1x128xf32>,
    %55 = vector.shape_cast %51 : vector<32x128xf32> to vector<2x16x128xf32>
    %c0_49 = arith.constant 0 : index
    %c1_50 = arith.constant 1 : index
    %c0_51 = arith.constant 0 : index
    %56 = vector.load %arg12[%c0_49, %c1_50, %c0_51] : memref<2x18x128xf32, #tpu.memory_space<vmem>>, vector<2x16x128xf32>
    tpu.vector_store %arg12[%c0_49, %c1_50, %c0_51], %55 {strides = array<i32>} : memref<2x18x128xf32, #tpu.memory_space<vmem>>, vector<2x16x128xf32>,
    %c0_52 = arith.constant 0 : index
    %c0_53 = arith.constant 0 : index
    %c0_54 = arith.constant 0 : index
    %57 = vector.load %arg12[%c0_52, %c0_53, %c0_54] : memref<2x18x128xf32, #tpu.memory_space<vmem>>, vector<2x16x128xf32>
    %58 = vector.shape_cast %57 : vector<2x16x128xf32> to vector<32x128xf32>
    %c0_55 = arith.constant 0 : index
    %c2_56 = arith.constant 2 : index
    %c0_57 = arith.constant 0 : index
    %59 = vector.load %arg12[%c0_55, %c2_56, %c0_57] : memref<2x18x128xf32, #tpu.memory_space<vmem>>, vector<2x16x128xf32>
    %60 = vector.shape_cast %59 : vector<2x16x128xf32> to vector<32x128xf32>
    %c0_58 = arith.constant 0 : index
    %c0_59 = arith.constant 0 : index
    %c0_60 = arith.constant 0 : index
    %61 = vector.load %arg2[%c0_58, %c0_59, %c0_60] : memref<3x128x128xf32, #tpu.memory_space<vmem>>, vector<1x128x128xf32>
    %62 = vector.shape_cast %61 : vector<1x128x128xf32> to vector<128x128xf32>
    %cst_61 = arith.constant dense<0.000000e+00> : vector<32x128xf32>
    %63 = tpu.matmul %58, %62, %cst_61 {dimension_numbers = #tpu.dot_dimension_numbers<[1], [0], [0], [1], [0, 0, 1, 1], [], []>} : vector<32x128xf32>, vector<128x128xf32>, vector<32x128xf32> -> vector<32x128xf32>
    %c1_62 = arith.constant 1 : index
    %c0_63 = arith.constant 0 : index
    %c0_64 = arith.constant 0 : index
    %64 = vector.load %arg2[%c1_62, %c0_63, %c0_64] : memref<3x128x128xf32, #tpu.memory_space<vmem>>, vector<1x128x128xf32>
    %65 = vector.shape_cast %64 : vector<1x128x128xf32> to vector<128x128xf32>
    %cst_65 = arith.constant dense<0.000000e+00> : vector<32x128xf32>
    %66 = tpu.matmul %51, %65, %cst_65 {dimension_numbers = #tpu.dot_dimension_numbers<[1], [0], [0], [1], [0, 0, 1, 1], [], []>} : vector<32x128xf32>, vector<128x128xf32>, vector<32x128xf32> -> vector<32x128xf32>
    %67 = arith.addf %63, %66 : vector<32x128xf32>
    %c2_66 = arith.constant 2 : index
    %c0_67 = arith.constant 0 : index
    %c0_68 = arith.constant 0 : index
    %68 = vector.load %arg2[%c2_66, %c0_67, %c0_68] : memref<3x128x128xf32, #tpu.memory_space<vmem>>, vector<1x128x128xf32>
    %69 = vector.shape_cast %68 : vector<1x128x128xf32> to vector<128x128xf32>
    %cst_69 = arith.constant dense<0.000000e+00> : vector<32x128xf32>
    %70 = tpu.matmul %60, %69, %cst_69 {dimension_numbers = #tpu.dot_dimension_numbers<[1], [0], [0], [1], [0, 0, 1, 1], [], []>} : vector<32x128xf32>, vector<128x128xf32>, vector<32x128xf32> -> vector<32x128xf32>
    %71 = arith.addf %67, %70 : vector<32x128xf32>
    %c0_70 = arith.constant 0 : index
    %c0_71 = arith.constant 0 : index
    %72 = vector.load %arg6[%c0_70, %c0_71] : memref<1x128xf32, #tpu.memory_space<vmem>>, vector<1x128xf32>
    %73 = vector.broadcast %72 : vector<1x128xf32> to vector<32x128xf32>
    %74 = arith.addf %71, %73 : vector<32x128xf32>
    %cst_72 = arith.constant 0.000000e+00 : f32
    %75 = vector.broadcast %cst_72 : f32 to vector<32x128xf32>
    %76 = arith.maximumf %74, %75 : vector<32x128xf32>
    %c0_73 = arith.constant 0 : index
    %c0_74 = arith.constant 0 : index
    %77 = vector.load %arg7[%c0_73, %c0_74] : memref<1x128xf32, #tpu.memory_space<vmem>>, vector<1x128xf32>
    %c0_75 = arith.constant 0 : index
    %c0_76 = arith.constant 0 : index
    %78 = vector.load %arg8[%c0_75, %c0_76] : memref<1x128xf32, #tpu.memory_space<vmem>>, vector<1x128xf32>
    %cst_77 = arith.constant dense<0.000000e+00> : vector<128xf32>
    %79 = vector.multi_reduction <add>, %76, %cst_77 [0] : vector<32x128xf32> to vector<128xf32>
    %80 = vector.shape_cast %79 : vector<128xf32> to vector<1x128xf32>
    %81 = arith.mulf %76, %76 : vector<32x128xf32>
    %cst_78 = arith.constant dense<0.000000e+00> : vector<128xf32>
    %82 = vector.multi_reduction <add>, %81, %cst_78 [0] : vector<32x128xf32> to vector<128xf32>
    %83 = vector.shape_cast %82 : vector<128xf32> to vector<1x128xf32>
    %cst_79 = arith.constant dense<0.000000e+00> : vector<1x128xf32>
    %84 = tpu.matmul %80, %0, %cst_79 {dimension_numbers = #tpu.dot_dimension_numbers<[1], [0], [0], [1], [0, 0, 1, 1], [], []>} : vector<1x128xf32>, vector<128x128xf32>, vector<1x128xf32> -> vector<1x128xf32>
    %cst_80 = arith.constant dense<0.000000e+00> : vector<1x128xf32>
    %85 = tpu.matmul %83, %0, %cst_80 {dimension_numbers = #tpu.dot_dimension_numbers<[1], [0], [0], [1], [0, 0, 1, 1], [], []>} : vector<1x128xf32>, vector<128x128xf32>, vector<1x128xf32> -> vector<1x128xf32>
    %cst_81 = arith.constant 0.001953125 : f32
    %86 = vector.broadcast %cst_81 : f32 to vector<1x128xf32>
    %87 = arith.mulf %84, %86 : vector<1x128xf32>
    %cst_82 = arith.constant 0.001953125 : f32
    %88 = vector.broadcast %cst_82 : f32 to vector<1x128xf32>
    %89 = arith.mulf %85, %88 : vector<1x128xf32>
    %90 = arith.mulf %87, %87 : vector<1x128xf32>
    %91 = arith.subf %89, %90 : vector<1x128xf32>
    %cst_83 = arith.constant 9.99999974E-6 : f32
    %92 = vector.broadcast %cst_83 : f32 to vector<1x128xf32>
    %93 = arith.addf %91, %92 : vector<1x128xf32>
    %94 = math.rsqrt %93 : vector<1x128xf32>
    %95 = arith.mulf %77, %94 : vector<1x128xf32>
    %96 = arith.mulf %87, %95 : vector<1x128xf32>
    %97 = arith.subf %78, %96 : vector<1x128xf32>
    %98 = vector.broadcast %95 : vector<1x128xf32> to vector<32x128xf32>
    %99 = arith.mulf %76, %98 : vector<32x128xf32>
    %100 = vector.broadcast %97 : vector<1x128xf32> to vector<32x128xf32>
    %101 = arith.addf %99, %100 : vector<32x128xf32>
    %c0_84 = arith.constant 0 : index
    %c0_85 = arith.constant 0 : index
    %102 = vector.load %arg10[%c0_84, %c0_85] : memref<32x128xf32, #tpu.memory_space<vmem>>, vector<32x128xf32>
    tpu.vector_store %arg10[%c0_84, %c0_85], %101 {strides = array<i32>} : memref<32x128xf32, #tpu.memory_space<vmem>>, vector<32x128xf32>,
    return
  }
}

</mosaic_0001>

<bundles_post_ra>
// kernel: tpu_custom_call.1
= control target key start
LH: loop header
LB: loop body
LE: loop exit
PB: predicated region body
PF: predicated region fallthrough
CT: control target
= control target key end

     0   :  { %15 = vsyncpa [#allocation5], 0  ;;  %s2710_s0 = inlined_call_operand.hbm [shape: f32[2,16,64], index: 0, kind: input, shape index: {}]   ;;  %s2711_s1 = inlined_call_operand.hbm [shape: f32[3,64,128], index: 1, kind: input, shape index: {}]   ;;  %s2712_s2 = inlined_call_operand.hbm [shape: f32[3,128,128], index: 2, kind: input, shape index: {}]   ;;  %s2713_s3 = inlined_call_operand.hbm [shape: f32[1,128], index: 3, kind: input, shape index: {}]   ;;  %s2714_s4 = inlined_call_operand.hbm [shape: f32[1,128], index: 4, kind: input, shape index: {}]   ;;  %s2715_s5 = inlined_call_operand.hbm [shape: f32[1,128], index: 5, kind: input, shape index: {}]   ;;  %s2716_s6 = inlined_call_operand.hbm [shape: f32[1,128], index: 6, kind: input, shape index: {}]   ;;  %s2717_s7 = inlined_call_operand.hbm [shape: f32[1,128], index: 7, kind: input, shape index: {}]   ;;  %s2718_s8 = inlined_call_operand.hbm [shape: f32[1,128], index: 8, kind: input, shape index: {}]   ;;  %s2719_s9 = inlined_call_operand.hbm [shape: f32[128,128], index: 9, kind: input, shape index: {}]   ;;  %s2720_s10 = inlined_call_operand.hbm [shape: f32[32,128], index: 10, kind: output, shape index: {}]  }
   0x1   :  { %16 = vsyncpa [#allocation8], 0 }
   0x2   :  { %17 = vsyncpa [#allocation11], 0 }
   0x3   :  { %18 = vsyncpa [#allocation14], 0 }
   0x4   :  { %19 = vsyncpa [#allocation17], 0 }
   0x5   :  { %20 = vsyncpa [#allocation20], 0 }
   0x6   :  { %21 = vsyncpa [#allocation6], 0  ;;  %s2316_s13 = smov [#allocation7]   ;;  %s2317_s15 = smov [#allocation10]  }
   0x7   :  { %s39_s14 = sshll.u32 %s2316_s13, 4  ;;  %s64_s16 = sshll.u32 %s2317_s15, 4  ;;  %s40_s14 = int_to_ptr.vmem [resolvable:$true] %s39_s14  ;;  %s2387_s16 = int_to_ptr.vmem [resolvable:$true] %s64_s16 }
   0x8   :  { %s2060_s19 = scalar_lea.hbm %s2711_s1, 3072 }
   0x9   :  { %p2061_p0 = scmp.ne.s32.totalorder %s2711_s1, %s2060_s19  ;;  %p2064_p1 = scmp.lt.u32.totalorder %s2060_s19, %s2711_s1 }
   0xb   :  { %p2066_p2 = pnand %p2064_p1, %p2061_p0 }
   0xd   :  { %2069 = shalt.err (!%p2066_p2)
}
   0xe   :  { %s2070_s24 = scalar_lea.vmem %s40_s14, 3072  ;;  %p2075_p4 = scmp.lt.s32.totalorder %s40_s14, %s40_s14 }
   0xf   :  { %p2071_p3 = scmp.ne.s32.totalorder %s40_s14, %s2070_s24  ;;  %p2076_p5 = scmp.lt.s32.totalorder %s2070_s24, %s2070_s24 }
  0x11   :  { %p2077_p6 = por %p2076_p5, %p2075_p4 }
  0x13   :  { %p2078_p7 = pnand %p2077_p6, %p2071_p3 }
  0x15   :  { %2081 = shalt.err (!%p2078_p7)
}
  0x16   :  { %s2318_s25 = smov 128   ;;  %s2319_s26 = smov 8  }
  0x17   :  { %45 = dma.hbm_to_vmem [thread:$0]  %s2711_s1, 3072, %s40_s14, [#allocation8], %s2318_s25, %s2318_s25, %s2319_s26  }
  0x18   :  { %s2082_s11 = scalar_lea.hbm %s2713_s3, 16 }
  0x19   :  { %p2083_p8 = scmp.ne.s32.totalorder %s2713_s3, %s2082_s11  ;;  %p2086_p9 = scmp.lt.u32.totalorder %s2082_s11, %s2713_s3 }
  0x1b   :  { %p2088_p10 = pnand %p2086_p9, %p2083_p8 }
  0x1d   :  { %2091 = shalt.err (!%p2088_p10)
}
  0x1e   :  { %s2092_s18 = scalar_lea.vmem %s2387_s16, 16  ;;  %s2096_s1 = scalar_lea.vmem %s2387_s16, 32 }
  0x1f   :  { %p2093_p11 = scmp.ne.s32.totalorder %s2387_s16, %s2092_s18  ;;  %p2097_p12 = scmp.lt.s32.totalorder %s2387_s16, %s2387_s16 }
  0x20   :  { %p2098_p13 = scmp.lt.s32.totalorder %s2096_s1, %s2092_s18 }
  0x22   :  { %p2099_p0 = por %p2098_p13, %p2097_p12 }
  0x24   :  { %p2100_p1 = pnand %p2099_p0, %p2093_p11 }
  0x26   :  { %2103 = shalt.err (!%p2100_p1)
}
  0x27   :  { %67 = dma.hbm_to_vmem [thread:$0]  %s2713_s3, 16, %s2387_s16, [#allocation11]  }
  0x28   :  { %s2320_s20 = smov [#allocation13]   ;;  %s2321_s22 = smov [#allocation16]  }
  0x29   :  { %s84_s21 = sshll.u32 %s2320_s20, 4  ;;  %s104_s23 = sshll.u32 %s2321_s22, 4  ;;  %s85_s21 = int_to_ptr.vmem [resolvable:$true] %s84_s21  ;;  %s105_s23 = int_to_ptr.vmem [resolvable:$true] %s104_s23 }
  0x2a   :  { %s2104_s28 = scalar_lea.hbm %s2715_s5, 16 }
  0x2b   :  { %p2105_p2 = scmp.ne.s32.totalorder %s2715_s5, %s2104_s28  ;;  %p2108_p3 = scmp.lt.u32.totalorder %s2104_s28, %s2715_s5 }
  0x2d   :  { %p2110_p4 = pnand %p2108_p3, %p2105_p2 }
  0x2f   :  { %2113 = shalt.err (!%p2110_p4)
}
  0x30   :  { %s2114_s3 = scalar_lea.vmem %s85_s21, 16  ;;  %s2118_s16 = scalar_lea.vmem %s85_s21, 32 }
  0x31   :  { %p2115_p5 = scmp.ne.s32.totalorder %s85_s21, %s2114_s3  ;;  %p2119_p6 = scmp.lt.s32.totalorder %s85_s21, %s85_s21 }
  0x32   :  { %p2120_p7 = scmp.lt.s32.totalorder %s2118_s16, %s2114_s3 }
  0x34   :  { %p2121_p8 = por %p2120_p7, %p2119_p6 }
  0x36   :  { %p2122_p9 = pnand %p2121_p8, %p2115_p5 }
  0x38   :  { %2125 = shalt.err (!%p2122_p9)
}
  0x39   :  { %87 = dma.hbm_to_vmem [thread:$0]  %s2715_s5, 16, %s85_s21, [#allocation14]  }
  0x3a   :  { %s2126_s1 = scalar_lea.hbm %s2717_s7, 16 }
  0x3b   :  { %p2127_p10 = scmp.ne.s32.totalorder %s2717_s7, %s2126_s1  ;;  %p2130_p11 = scmp.lt.u32.totalorder %s2126_s1, %s2717_s7 }
  0x3d   :  { %p2132_p12 = pnand %p2130_p11, %p2127_p10 }
  0x3f   :  { %2135 = shalt.err (!%p2132_p12)
}
  0x40   :  { %s2136_s24 = scalar_lea.vmem %s105_s23, 16  ;;  %s2140_s27 = scalar_lea.vmem %s105_s23, 32 }
  0x41   :  { %p2137_p13 = scmp.ne.s32.totalorder %s105_s23, %s2136_s24  ;;  %p2141_p0 = scmp.lt.s32.totalorder %s105_s23, %s105_s23 }
  0x42   :  { %p2142_p1 = scmp.lt.s32.totalorder %s2140_s27, %s2136_s24 }
  0x44   :  { %p2143_p2 = por %p2142_p1, %p2141_p0 }
  0x46   :  { %p2144_p3 = pnand %p2143_p2, %p2137_p13 }
  0x48   :  { %2147 = shalt.err (!%p2144_p3)
}
  0x49   :  { %107 = dma.hbm_to_vmem [thread:$0]  %s2717_s7, 16, %s105_s23, [#allocation17]  }
  0x4a   :  { %s2322_s28 = smov [#allocation4]   ;;  %s2323_s30 = smov [#allocation9]  }
  0x4b   :  { %s27_s29 = sshll.u32 %s2322_s28, 4  ;;  %s51_s11 = sshll.u32 %s2323_s30, 4  ;;  %s28_s29 = int_to_ptr.vmem [resolvable:$true] %s27_s29  ;;  %s2446_s11 = int_to_ptr.vmem [resolvable:$true] %s51_s11 }
  0x4c   :  { %s2148_s16 = scalar_lea.hbm %s2710_s0, 512 }
  0x4d   :  { %p2149_p4 = scmp.ne.s32.totalorder %s2710_s0, %s2148_s16  ;;  %p2152_p5 = scmp.lt.u32.totalorder %s2148_s16, %s2710_s0 }
  0x4f   :  { %p2154_p6 = pnand %p2152_p5, %p2149_p4 }
  0x51   :  { %2157 = shalt.err (!%p2154_p6)
}
  0x52   :  { %s2158_s7 = scalar_lea.vmem %s28_s29, 512  ;;  %p2163_p8 = scmp.lt.s32.totalorder %s28_s29, %s28_s29 }
  0x53   :  { %p2159_p7 = scmp.ne.s32.totalorder %s28_s29, %s2158_s7  ;;  %p2164_p9 = scmp.lt.s32.totalorder %s2158_s7, %s2158_s7 }
  0x55   :  { %p2165_p10 = por %p2164_p9, %p2163_p8 }
  0x57   :  { %p2166_p11 = pnand %p2165_p10, %p2159_p7 }
  0x59   :  { %2169 = shalt.err (!%p2166_p11)
}
  0x5a   :  { %33 = dma.hbm_to_vmem [thread:$0]  %s2710_s0, 512, %s28_s29, [#allocation5], %s2318_s25, %s2318_s25, %s2319_s26  }
  0x5b   :  { %s2170_s20 = scalar_lea.hbm %s2712_s2, 6144 }
  0x5c   :  { %p2171_p12 = scmp.ne.s32.totalorder %s2712_s2, %s2170_s20  ;;  %p2174_p13 = scmp.lt.u32.totalorder %s2170_s20, %s2712_s2 }
  0x5e   :  { %p2176_p0 = pnand %p2174_p13, %p2171_p12 }
  0x60   :  { %2179 = shalt.err (!%p2176_p0)
}
  0x61   :  { %s2180_s21 = scalar_lea.vmem %s2446_s11, 6144  ;;  %p2185_p2 = scmp.lt.s32.totalorder %s2446_s11, %s2446_s11 }
  0x62   :  { %p2181_p1 = scmp.ne.s32.totalorder %s2446_s11, %s2180_s21  ;;  %p2186_p3 = scmp.lt.s32.totalorder %s2180_s21, %s2180_s21 }
  0x64   :  { %p2187_p4 = por %p2186_p3, %p2185_p2 }
  0x66   :  { %p2188_p5 = pnand %p2187_p4, %p2181_p1 }
  0x68   :  { %2191 = shalt.err (!%p2188_p5)
}
  0x69   :  { %57 = dma.hbm_to_vmem [thread:$0]  %s2712_s2, 6144, %s2446_s11, [#allocation8], %s2318_s25, %s2318_s25, %s2319_s26  }
  0x6a   :  { %s2324_s29 = smov [#allocation12]   ;;  %s2325_s12 = smov [#allocation15]  }
  0x6b   :  { %s74_s30 = sshll.u32 %s2324_s29, 4  ;;  %s94_s3 = sshll.u32 %s2325_s12, 4  ;;  %s75_s30 = int_to_ptr.vmem [resolvable:$true] %s74_s30  ;;  %s95_s3 = int_to_ptr.vmem [resolvable:$true] %s94_s3 }
  0x6c   :  { %s2192_s15 = scalar_lea.hbm %s2714_s4, 16 }
  0x6d   :  { %p2193_p6 = scmp.ne.s32.totalorder %s2714_s4, %s2192_s15  ;;  %p2196_p7 = scmp.lt.u32.totalorder %s2192_s15, %s2714_s4 }
  0x6f   :  { %p2198_p8 = pnand %p2196_p7, %p2193_p6 }
  0x71   :  { %2201 = shalt.err (!%p2198_p8)
}
  0x72   :  { %s2202_s2 = scalar_lea.vmem %s75_s30, 16  ;;  %s2206_s11 = scalar_lea.vmem %s75_s30, 32 }
  0x73   :  { %p2203_p9 = scmp.ne.s32.totalorder %s75_s30, %s2202_s2  ;;  %p2207_p10 = scmp.lt.s32.totalorder %s75_s30, %s75_s30 }
  0x74   :  { %p2208_p11 = scmp.lt.s32.totalorder %s2206_s11, %s2202_s2 }
  0x76   :  { %p2209_p12 = por %p2208_p11, %p2207_p10 }
  0x78   :  { %p2210_p13 = pnand %p2209_p12, %p2203_p9 }
  0x7a   :  { %2213 = shalt.err (!%p2210_p13)
}
  0x7b   :  { %77 = dma.hbm_to_vmem [thread:$0]  %s2714_s4, 16, %s75_s30, [#allocation11]  }
  0x7c   :  { %s2214_s22 = scalar_lea.hbm %s2716_s6, 16 }
  0x7d   :  { %p2215_p0 = scmp.ne.s32.totalorder %s2716_s6, %s2214_s22  ;;  %p2218_p1 = scmp.lt.u32.totalorder %s2214_s22, %s2716_s6 }
  0x7f   :  { %p2220_p2 = pnand %p2218_p1, %p2215_p0 }
  0x81   :  { %2223 = shalt.err (!%p2220_p2)
}
  0x82   :  { %s2224_s0 = scalar_lea.vmem %s95_s3, 16  ;;  %s2228_s28 = scalar_lea.vmem %s95_s3, 32 }
  0x83   :  { %p2225_p3 = scmp.ne.s32.totalorder %s95_s3, %s2224_s0  ;;  %p2229_p4 = scmp.lt.s32.totalorder %s95_s3, %s95_s3 }
  0x84   :  { %p2230_p5 = scmp.lt.s32.totalorder %s2228_s28, %s2224_s0 }
  0x86   :  { %p2231_p6 = por %p2230_p5, %p2229_p4 }
  0x88   :  { %p2232_p7 = pnand %p2231_p6, %p2225_p3 }
  0x8a   :  { %2235 = shalt.err (!%p2232_p7)
}
  0x8b   :  { %97 = dma.hbm_to_vmem [thread:$0]  %s2716_s6, 16, %s95_s3, [#allocation14]  }
  0x8c   :  { %s2326_s30 = smov [#allocation18]   ;;  %s2327_s16 = smov [#allocation19]  }
  0x8d   :  { %s114_s12 = sshll.u32 %s2326_s30, 4  ;;  %s123_s13 = sshll.u32 %s2327_s16, 4  ;;  %s115_s12 = int_to_ptr.vmem [resolvable:$true] %s114_s12  ;;  %s2507_s13 = int_to_ptr.vmem [resolvable:$true] %s123_s13 }
  0x8e   :  { %s2236_s18 = scalar_lea.hbm %s2718_s8, 16 }
  0x8f   :  { %p2237_p8 = scmp.ne.s32.totalorder %s2718_s8, %s2236_s18  ;;  %p2240_p9 = scmp.lt.u32.totalorder %s2236_s18, %s2718_s8 }
  0x91   :  { %p2242_p10 = pnand %p2240_p9, %p2237_p8 }
  0x93   :  { %2245 = shalt.err (!%p2242_p10)
}
  0x94   :  { %s2246_s6 = scalar_lea.vmem %s115_s12, 16  ;;  %s2250_s3 = scalar_lea.vmem %s115_s12, 32 }
  0x95   :  { %p2247_p11 = scmp.ne.s32.totalorder %s115_s12, %s2246_s6  ;;  %p2251_p12 = scmp.lt.s32.totalorder %s115_s12, %s115_s12 }
  0x96   :  { %p2252_p13 = scmp.lt.s32.totalorder %s2250_s3, %s2246_s6 }
  0x98   :  { %p2253_p0 = por %p2252_p13, %p2251_p12 }
  0x9a   :  { %p2254_p1 = pnand %p2253_p0, %p2247_p11 }
  0x9c   :  { %2257 = shalt.err (!%p2254_p1)
}
  0x9d   :  { %117 = dma.hbm_to_vmem [thread:$0]  %s2718_s8, 16, %s115_s12, [#allocation17]  }
  0x9e   :  { %s2258_s22 = scalar_lea.hbm %s2719_s9, 2048 }
  0x9f   :  { %p2259_p2 = scmp.ne.s32.totalorder %s2719_s9, %s2258_s22  ;;  %p2262_p3 = scmp.lt.u32.totalorder %s2258_s22, %s2719_s9 }
  0xa1   :  { %p2264_p4 = pnand %p2262_p3, %p2259_p2 }
  0xa3   :  { %2267 = shalt.err (!%p2264_p4)
}
  0xa4   :  { %s2268_s0 = scalar_lea.vmem %s2507_s13, 2048  ;;  %p2273_p6 = scmp.lt.s32.totalorder %s2507_s13, %s2507_s13 }
  0xa5   :  { %p2269_p5 = scmp.ne.s32.totalorder %s2507_s13, %s2268_s0  ;;  %p2274_p7 = scmp.lt.s32.totalorder %s2268_s0, %s2268_s0 }
  0xa7   :  { %p2275_p8 = por %p2274_p7, %p2273_p6 }
  0xa9   :  { %p2276_p9 = pnand %p2275_p8, %p2269_p5 }
  0xab   :  { %2279 = shalt.err (!%p2276_p9)
}
  0xac   :  { %129 = dma.hbm_to_vmem [thread:$0]  %s2719_s9, 2048, %s2507_s13, [#allocation20], %s2318_s25, %s2318_s25, %s2319_s26  }
  0xad   :  { %2302 = dma.done.wait [#allocation5], 512  }
  0xae   :  { %2303 = vsyncadd [#allocation5], 4294966784 }
  0xaf   :  { %2304 = dma.done.wait [#allocation8], 9216  }
  0xb0   :  { %2305 = vsyncadd [#allocation8], 4294958080 }
  0xb1   :  { %2306 = dma.done.wait [#allocation11], 32  }
  0xb2   :  { %2307 = vsyncadd [#allocation11], 4294967264 }
  0xb3   :  { %2308 = dma.done.wait [#allocation14], 32  }
  0xb4   :  { %2309 = vsyncadd [#allocation14], 4294967264 }
  0xb5   :  { %2310 = dma.done.wait [#allocation17], 32  }
  0xb6   :  { %2311 = vsyncadd [#allocation17], 4294967264 }
  0xb7   :  { %2312 = dma.done.wait [#allocation20], 2048  }
  0xb8   :  { %2313 = vsyncadd [#allocation20], 4294965248  ;;  %vm180_vm0 = vcmask 516096   ;;  %v2328_v0 = vmov 0.0   ;;  %v198_v1 = vld [vmem:[#allocation7] sm:$0xff]  ;;  %v199_v2 = vld [vmem:[#allocation7 + $0x8] sm:$0xff] }
  0xb9   :  { %181 = vst.msk [vmem:[#allocation2] sm:$0x1] %vm180_vm0, %v2328_v0  ;;  %182 = vst.msk [vmem:[#allocation2 + $0x18] sm:$0x1] %vm180_vm0, %v2328_v0  ;;  %v200_v3 = vld [vmem:[#allocation7 + $0x10] sm:$0xff]  ;;  %v1800_v4 = vpack.c.bf16 %v199_v2, %v198_v1  ;;  %v201_v5 = vld [vmem:[#allocation7 + $0x18] sm:$0xff] }
  0xba   :  { %183 = vst.msk [vmem:[#allocation2 + $0x11] sm:$0x1] %vm180_vm0, %v2328_v0  ;;  %184 = vst.msk [vmem:[#allocation2 + $0x29] sm:$0x1] %vm180_vm0, %v2328_v0  ;;  %vm185_vm1 = vcmask 523264   ;;  %v1804_v6 = vpack.c.bf16 %v201_v5, %v200_v3  ;;  %v202_v7 = vld [vmem:[#allocation7 + $0x20] sm:$0xff] }
  0xbb   :  { %727 = vst [vmem:[#allocation3] sm:$0x1] %v2328_v0  ;;  %728 = vst [vmem:[#allocation3 + $0x18] sm:$0x1] %v2328_v0  ;;  %v203_v8 = vld [vmem:[#allocation7 + $0x28] sm:$0xff]  ;;  %v207_v9 = vld [vmem:[#allocation7 + $0x40] sm:$0xff]  ;;  %1801 = vmatprep.subr.bf16.mxu0 %v1800_v4 }
  0xbc   :  { %729 = vst [vmem:[#allocation3 + $0x11] sm:$0x1] %v2328_v0  ;;  %730 = vst [vmem:[#allocation3 + $0x29] sm:$0x1] %v2328_v0  ;;  %v208_v10 = vld [vmem:[#allocation7 + $0x48] sm:$0xff]  ;;  %v176_v11 = vld [vmem:[#allocation4] sm:$0xff]  ;;  %1803 = vmatpush3.bf16.msra.mxu0 %v1800_v4  ;;  %v1808_v15 = vpack.c.bf16 %v203_v8, %v202_v7 }
  0xbd   :  { %v1784_v12 = vpack.c.bf16 %v208_v10, %v207_v9  ;;  %186 = vst.msk [vmem:[#allocation2 + $0x1] sm:$0xff] %vm185_vm1, %v176_v11  ;;  %v177_v13 = vld [vmem:[#allocation4 + $0x8] sm:$0xff]  ;;  %v209_v14 = vld [vmem:[#allocation7 + $0x50] sm:$0xff]  ;;  %1480 = vmatprep.mubr.msk.f32.mxu1 %vm185_vm1, %v176_v11  ;;  %1805 = vmatprep.subr.bf16.mxu0 %v1804_v6  ;;  %v210_v17 = vld [vmem:[#allocation7 + $0x58] sm:$0xff]  ;;  %v2329_v45 = vmov 0.0|0.0   ;;  %vm2330_vm2 = vmmov 0  }
  0xbe   :  { %v204_v16 = vld [vmem:[#allocation7 + $0x30] sm:$0xff]  ;;  %187 = vst.msk [vmem:[#allocation2 + $0x9] sm:$0xff] %vm185_vm1, %v177_v13  ;;  %v205_v18 = vld [vmem:[#allocation7 + $0x38] sm:$0xff]  ;;  %v1788_v19 = vpack.c.bf16 %v210_v17, %v209_v14  ;;  %v211_v20 = vld [vmem:[#allocation7 + $0x60] sm:$0xff]  ;;  %s2331_s9 = smov [#allocation21]  }
  0xbf   :  { %1785 = vmatprep.subr.bf16.mxu1 %v1784_v12  ;;  %v212_v21 = vld [vmem:[#allocation7 + $0x68] sm:$0xff]  ;;  %v178_v22 = vld [vmem:[#allocation4 + $0x10] sm:$0xff]  ;;  %v179_v23 = vld [vmem:[#allocation4 + $0x18] sm:$0xff]  ;;  %v1812_v24 = vpack.c.bf16 %v205_v18, %v204_v16  ;;  %s1269_s4 = sshll.u32 %s2331_s9, 4  ;;  %s1270_s4 = int_to_ptr.vmem [resolvable:$true] %s1269_s4 }
  0xc0   :  { %1787 = vmatpush3.bf16.msra.mxu1 %v1784_v12  ;;  %1807 = vmatpush3.bf16.msra.mxu0 %v1804_v6  ;;  %v1792_v25 = vpack.c.bf16 %v212_v21, %v211_v20  ;;  %v213_v26 = vld [vmem:[#allocation7 + $0x70] sm:$0xff]  ;;  %v214_v27 = vld [vmem:[#allocation7 + $0x78] sm:$0xff]  ;;  %188 = vst.msk [vmem:[#allocation2 + $0x19] sm:$0xff] %vm185_vm1, %v178_v22  ;;  %189 = vst.msk [vmem:[#allocation2 + $0x21] sm:$0xff] %vm185_vm1, %v179_v23  ;;  %s2280_s29 = scalar_lea.vmem %s1270_s4, 512  ;;  %p2285_p11 = scmp.lt.s32.totalorder %s1270_s4, %s1270_s4 }
  0xc1   :  { %1789 = vmatprep.subr.bf16.mxu1 %v1788_v19  ;;  %1809 = vmatprep.subr.bf16.mxu0 %v1808_v15  ;;  %v410_v28 = vld [vmem:[#allocation7 + $0x80] sm:$0xff]  ;;  %v411_v29 = vld [vmem:[#allocation7 + $0x88] sm:$0xff]  ;;  %v1796_v31 = vpack.c.bf16 %v214_v27, %v213_v26  ;;  %v412_v33 = vld [vmem:[#allocation7 + $0x90] sm:$0xff]  ;;  %p2281_p10 = scmp.ne.s32.totalorder %s1270_s4, %s2280_s29  ;;  %p2286_p12 = scmp.lt.s32.totalorder %s2280_s29, %s2280_s29 }
  0xc2   :  { %v1816_v32 = vpack.c.bf16 %v411_v29, %v410_v28  ;;  %v413_v34 = vld [vmem:[#allocation7 + $0x98] sm:$0xff]  ;;  %v414_v37 = vld [vmem:[#allocation7 + $0xa0] sm:$0xff]  ;;  %v415_v39 = vld [vmem:[#allocation7 + $0xa8] sm:$0xff] }
  0xc3   :  { %v1820_v36 = vpack.c.bf16 %v413_v34, %v412_v33  ;;  %v160_v40 = vld [vmem:[#allocation19] sm:$0xff]  ;;  %v161_v41 = vld [vmem:[#allocation19 + $0x8] sm:$0xff]  ;;  %v1824_v43 = vpack.c.bf16 %v415_v39, %v414_v37  ;;  %v162_v53 = vld [vmem:[#allocation19 + $0x10] sm:$0xff]  ;;  %p2287_p13 = por %p2286_p12, %p2285_p11 }
  0xc4   :  { %v190_v30 = vld [vmem:[#allocation2] sm:$0xff]  ;;  %1791 = vmatpush3.bf16.msra.mxu1 %v1788_v19  ;;  %1811 = vmatpush3.bf16.msra.mxu0 %v1808_v15  ;;  %v2558_v46 = vpack.c.bf16 %v161_v41, %v160_v40  ;;  %v416_v47 = vld [vmem:[#allocation7 + $0xb0] sm:$0xff]  ;;  %v417_v48 = vld [vmem:[#allocation7 + $0xb8] sm:$0xff] }
  0xc5   :  { %1502 = vmatprep.mubr.msk.f32.mxu0 %vm185_vm1, %v190_v30  ;;  %1813 = vmatprep.subr.bf16.mxu0 %v1812_v24  ;;  %v191_v35 = vld [vmem:[#allocation2 + $0x8] sm:$0xff]  ;;  %v1828_v49 = vpack.c.bf16 %v417_v48, %v416_v47  ;;  %v165_v57 = vld [vmem:[#allocation19 + $0x28] sm:$0xff]  ;;  %v166_v59 = vld [vmem:[#allocation19 + $0x30] sm:$0xff]  ;;  %p2288_p0 = pnand %p2287_p13, %p2281_p10 }
  0xc6   :  { %1793 = vmatprep.subr.bf16.mxu1 %v1792_v25  ;;  %v194_v44 = vld [vmem:[#allocation2 + $0x2] sm:$0xff]  ;;  %v195_v50 = vld [vmem:[#allocation2 + $0xa] sm:$0xff]  ;;  %v169_v63 = vld [vmem:[#allocation19 + $0x48] sm:$0xff] }
  0xc7   :  { %v192_v38 = vld [vmem:[#allocation2 + $0x18] sm:$0xff]  ;;  %v193_v42 = vld [vmem:[#allocation2 + $0x20] sm:$0xff]  ;;  %v164_v56 = vld [vmem:[#allocation19 + $0x20] sm:$0xff] }
  0xc8   :  { %1795 = vmatpush3.bf16.msra.mxu1 %v1792_v25  ;;  %1815 = vmatpush3.bf16.msra.mxu0 %v1812_v24  ;;  %v196_v51 = vld [vmem:[#allocation2 + $0x1a] sm:$0xff]  ;;  %v197_v52 = vld [vmem:[#allocation2 + $0x22] sm:$0xff]  ;;  %v2574_v58 = vpack.c.bf16 %v165_v57, %v164_v56  ;;  %v168_v62 = vld [vmem:[#allocation19 + $0x40] sm:$0xff] }
  0xc9   :  { %1797 = vmatprep.subr.bf16.mxu1 %v1796_v31  ;;  %1817 = vmatprep.subr.bf16.mxu0 %v1816_v32  ;;  %v163_v54 = vld [vmem:[#allocation19 + $0x18] sm:$0xff]  ;;  %v2582_v1 = vpack.c.bf16 %v169_v63, %v168_v62  ;;  %v170_v2 = vld [vmem:[#allocation19 + $0x50] sm:$0xff]  ;;  %v172_v5 = vld [vmem:[#allocation19 + $0x60] sm:$0xff] }
  0xca   :  { %v2570_v55 = vpack.c.bf16 %v163_v54, %v162_v53  ;;  %v167_v60 = vld [vmem:[#allocation19 + $0x38] sm:$0xff]  ;;  %v173_v6 = vld [vmem:[#allocation19 + $0x68] sm:$0xff]  ;;  %v174_v8 = vld [vmem:[#allocation19 + $0x70] sm:$0xff] }
  0xcb   :  { %1503 = vmatmul.mubr.msk.f32.vlgmr.msra.gmra.mrb[0].mxu0 %vm185_vm1, %v191_v35  ;;  %v2578_v61 = vpack.c.bf16 %v167_v60, %v166_v59  ;;  %v171_v3 = vld [vmem:[#allocation19 + $0x58] sm:$0xff]  ;;  %v2590_v7 = vpack.c.bf16 %v173_v6, %v172_v5  ;;  %v1298_v16 = vld [vmem:[#allocation10] ss:$0 sm:$0xff]  ;;  %v762_v62 = vld [vmem:[#allocation9 + $0x90] sm:$0xff] }
  0xcc   :  { %1799 = vmatpush3.bf16.msra.mxu1 %v1796_v31  ;;  %1819 = vmatpush3.bf16.msra.mxu0 %v1816_v32  ;;  %v2586_v4 = vpack.c.bf16 %v171_v3, %v170_v2  ;;  %v175_v9 = vld [vmem:[#allocation19 + $0x78] sm:$0xff]  ;;  %v763_v63 = vld [vmem:[#allocation9 + $0x98] sm:$0xff] }
  0xcd   :  { %1505 = vmatprep.mubr.msk.f32.mxu0 %vm185_vm1, %v192_v38  ;;  %1821 = vmatprep.subr.bf16.mxu0 %v1820_v36  ;;  %v2594_v10 = vpack.c.bf16 %v175_v9, %v174_v8  ;;  %v760_v57 = vld [vmem:[#allocation9 + $0x80] sm:$0xff]  ;;  %v761_v59 = vld [vmem:[#allocation9 + $0x88] sm:$0xff]  ;;  %v1884_v2 = vpack.c.bf16 %v763_v63, %v762_v62  ;;  %v766_v8 = vld [vmem:[#allocation9 + $0xb0] sm:$0xff] }
  0xce   :  { %1832 = vmatprep.subr.bf16.mxu1 %v2329_v45  ;;  %v1880_v60 = vpack.c.bf16 %v761_v59, %v760_v57  ;;  %v764_v3 = vld [vmem:[#allocation9 + $0xa0] sm:$0xff]  ;;  %v765_v5 = vld [vmem:[#allocation9 + $0xa8] sm:$0xff]  ;;  %v767_v9 = vld [vmem:[#allocation9 + $0xb8] sm:$0xff] }
  0xcf   :  { %1481 = vmatmul.mubr.msk.f32.vlgmr.msra.gmra.mrb[0].mxu1 %vm185_vm1, %v177_v13  ;;  %1506 = vmatmul.mubr.msk.f32.gmra.mrb[2].mxu0 %vm185_vm1, %v193_v42  ;;  %v1888_v6 = vpack.c.bf16 %v765_v5, %v764_v3  ;;  %v745_v57 = vld [vmem:[#allocation9 + $0x10] sm:$0xff]  ;;  %v746_v59 = vld [vmem:[#allocation9 + $0x18] sm:$0xff] }
  0xd0   :  { %1483 = vmatprep.mubr.msk.f32.mxu1 %vm185_vm1, %v178_v22  ;;  %1823 = vmatpush3.bf16.msra.mxu0 %v1820_v36  ;;  %v1916_v5 = vpack.c.bf16 %v746_v59, %v745_v57  ;;  %v962_v57 = vld [vmem:[#allocation9 + $0x178] sm:$0xff] }
  0xd1   :  { %1524 = vmatprep.mubr.msk.f32.mxu0 %vm185_vm1, %v194_v44  ;;  %1825 = vmatprep.subr.bf16.mxu0 %v1824_v43 }
  0xd2   :  { %1834 = vmatpush3.bf16.msra.mxu1 %v2558_v46 }
  0xd3   :  { %1484 = vmatmul.mubr.msk.f32.gmra.mrb[2].mxu1 %vm185_vm1, %v179_v23  ;;  %1835 = vmatprep.subr.bf16.mxu1 %v2329_v45 }
  0xd4   :  { %1827 = vmatpush3.bf16.msra.mxu0 %v1824_v43  ;;  %1562 = vmatprep.mubr.msk.f32.mxu1 %vm2330_vm2, %v2328_v0 }
  0xd5   :  { %1829 = vmatprep.subr.bf16.mxu0 %v1828_v49 }
  0xd6   :  { %1837 = vmatpush3.bf16.msra.mxu1 %v2570_v55 }
  0xd7   :  { %1838 = vmatprep.subr.bf16.mxu1 %v2329_v45 }
  0xd8   :  { %1831 = vmatpush3.bf16.msra.mxu0 %v1828_v49 }
  0xd9   :  { %1881 = vmatprep.subr.bf16.mxu0 %v1880_v60 }
  0xda   :  { %1840 = vmatpush3.bf16.msra.mxu1 %v2574_v58 }
  0xdb   :  { %1525 = vmatmul.mubr.msk.f32.vlgmr.msra.gmra.mrb[0].mxu0 %vm185_vm1, %v195_v50  ;;  %1841 = vmatprep.subr.bf16.mxu1 %v2329_v45 }
  0xdc   :  { %1527 = vmatprep.mubr.msk.f32.mxu0 %vm185_vm1, %v196_v51  ;;  %1883 = vmatpush3.bf16.msra.mxu0 %v1880_v60 }
  0xdd   :  { %1885 = vmatprep.subr.bf16.mxu0 %v1884_v2 }
  0xde   :  { %1843 = vmatpush3.bf16.msra.mxu1 %v2578_v61 }
  0xdf   :  { %1528 = vmatmul.mubr.msk.f32.gmra.mrb[2].mxu0 %vm185_vm1, %v197_v52  ;;  %1844 = vmatprep.subr.bf16.mxu1 %v2329_v45 }
  0xe0   :  { %1887 = vmatpush3.bf16.msra.mxu0 %v1884_v2 }
  0xe1   :  { %1889 = vmatprep.subr.bf16.mxu0 %v1888_v6 }
  0xe2   :  { %1846 = vmatpush3.bf16.msra.mxu1 %v2582_v1 }
  0xe3   :  { %1847 = vmatprep.subr.bf16.mxu1 %v2329_v45 }
  0xe4   :  { %1891 = vmatpush3.bf16.msra.mxu0 %v1888_v6  ;;  %v748_v6 = vld [vmem:[#allocation9 + $0x28] sm:$0xff] }
  0xe6   :  { %1849 = vmatpush3.bf16.msra.mxu1 %v2586_v4 }
  0xe7   :  { %1850 = vmatprep.subr.bf16.mxu1 %v2329_v45 }
  0xea   :  { %1852 = vmatpush3.bf16.msra.mxu1 %v2590_v7 }
  0xeb   :  { %1853 = vmatprep.subr.bf16.mxu1 %v2329_v45 }
  0xee   :  { %1855 = vmatpush3.bf16.msra.mxu1 %v2594_v10 }
  0xef   :  { %1856 = vmatprep.subr.bf16.mxu1 %v2329_v45 }
 0x1a2   :  { %v1482_v11 = vpop.f32.mrb[0].mxu1 }
 0x1a3   :  { %v293_v12 = vpop.f32.mrb[1].mxu1 }
 0x1a6   :  { %v1485_v13 = vpop.f32.mrb[2].mxu1 }
 0x1a7   :  { %v303_v14 = vpop.f32.mrb[3].mxu1 }
 0x1ae   :  { %v1526_v15 = vpop.f32.mrb[0].mxu0 }
 0x1af   :  { %v2024_v17 = vadd.f32 %v1526_v15, %v1482_v11  ;;  %v496_v18 = vpop.f32.mrb[1].mxu0  ;;  %v1892_v11 = vpack.c.bf16 %v767_v9, %v766_v8  ;;  %v770_v15 = vld [vmem:[#allocation9 + $0xd0] sm:$0xff]  ;;  %v750_v8 = vld [vmem:[#allocation9 + $0x38] sm:$0xff] }
 0x1b0   :  { %v2025_v19 = vadd.f32 %v496_v18, %v293_v12  ;;  %v768_v12 = vld [vmem:[#allocation9 + $0xc0] sm:$0xff] }
 0x1b1   :  { %v527_v20 = vadd.f32 %v2024_v17, %v1298_v16  ;;  %1893 = vmatprep.subr.bf16.mxu0 %v1892_v11  ;;  %v772_v18 = vld [vmem:[#allocation9 + $0xe0] sm:$0xff] }
 0x1b2   :  { %v526_v21 = vadd.f32 %v2025_v19, %v1298_v16  ;;  %v1529_v22 = vpop.f32.mrb[2].mxu0  ;;  %1895 = vmatpush3.bf16.msra.mxu0 %v1892_v11  ;;  %v773_v19 = vld [vmem:[#allocation9 + $0xe8] sm:$0xff]  ;;  %v751_v11 = vld [vmem:[#allocation9 + $0x40] sm:$0xff] }
 0x1b3   :  { %v2026_v23 = vadd.f32 %v1529_v22, %v1485_v13  ;;  %v506_v24 = vpop.f32.mrb[3].mxu0  ;;  %v2600_v25 = vmax.f32 %v527_v20, 0.0  ;;  %v769_v13 = vld [vmem:[#allocation9 + $0xc8] sm:$0xff]  ;;  %v1904_v20 = vpack.c.bf16 %v773_v19, %v772_v18  ;;  %v775_v22 = vld [vmem:[#allocation9 + $0xf8] sm:$0xff] }
 0x1b4   :  { %v2602_v26 = vmax.f32 %v526_v21, 0.0  ;;  %v2027_v27 = vadd.f32 %v506_v24, %v303_v14  ;;  %v1896_v14 = vpack.c.bf16 %v769_v13, %v768_v12  ;;  %v774_v21 = vld [vmem:[#allocation9 + $0xf0] sm:$0xff]  ;;  %v743_v24 = vld [vmem:[#allocation9] sm:$0xff]  ;;  %v752_v12 = vld [vmem:[#allocation9 + $0x48] sm:$0xff] }
 0x1b5   :  { %v529_v28 = vadd.f32 %v2026_v23, %v1298_v16  ;;  %v546_v39 = vmul.f32 %v2600_v25, %v2600_v25  ;;  %v1908_v23 = vpack.c.bf16 %v775_v22, %v774_v21  ;;  %v1928_v13 = vpack.c.bf16 %v752_v12, %v751_v11  ;;  %v756_v18 = vld [vmem:[#allocation9 + $0x68] sm:$0xff]  ;;  %v758_v21 = vld [vmem:[#allocation9 + $0x78] sm:$0xff] }
 0x1b6   :  { %v528_v29 = vadd.f32 %v2027_v27, %v1298_v16  ;;  %v536_v30 = vadd.f32 %v2600_v25, %v2602_v26  ;;  %v545_v40 = vmul.f32 %v2602_v26, %v2602_v26  ;;  %1897 = vmatprep.subr.bf16.mxu0 %v1896_v14  ;;  %v771_v16 = vld [vmem:[#allocation9 + $0xd8] sm:$0xff]  ;;  %v744_v27 = vld [vmem:[#allocation9 + $0x8] sm:$0xff] }
 0x1b7   :  { %v2608_v32 = vmax.f32 %v529_v28, 0.0  ;;  %1899 = vmatpush3.bf16.msra.mxu0 %v1896_v14  ;;  %v1900_v17 = vpack.c.bf16 %v771_v16, %v770_v15  ;;  %v1912_v28 = vpack.c.bf16 %v744_v27, %v743_v24  ;;  %v753_v14 = vld [vmem:[#allocation9 + $0x50] sm:$0xff]  ;;  %v754_v15 = vld [vmem:[#allocation9 + $0x58] sm:$0xff]  ;;  %v948_v24 = vld [vmem:[#allocation9 + $0x108] sm:$0xff] }
 0x1b8   :  { %v2606_v31 = vmax.f32 %v528_v29, 0.0  ;;  %v549_v44 = vadd.f32 %v546_v39, %v545_v40  ;;  %v708_v40 = vlaneseq  ;;  %v1932_v16 = vpack.c.bf16 %v754_v15, %v753_v14 }
 0x1b9   :  { %v548_v48 = vmul.f32 %v2608_v32, %v2608_v32  ;;  %1901 = vmatprep.subr.bf16.mxu0 %v1900_v17 }
 0x1ba   :  { %v537_v33 = vadd.f32 %v536_v30, %v2606_v31  ;;  %v547_v42 = vmul.f32 %v2606_v31, %v2606_v31 }
 0x1bb   :  { %1903 = vmatpush3.bf16.msra.mxu0 %v1900_v17  ;;  %v755_v17 = vld [vmem:[#allocation9 + $0x60] sm:$0xff] }
 0x1bc   :  { %v538_v34 = vadd.f32 %v537_v33, %v2608_v32  ;;  %v550_v47 = vadd.f32 %v549_v44, %v547_v42  ;;  %1905 = vmatprep.subr.bf16.mxu0 %v1904_v20  ;;  %v534_v42 = vld [vmem:[#allocation12] sm:$0x1]  ;;  %v1936_v19 = vpack.c.bf16 %v756_v18, %v755_v17 }
 0x1be   :  { %v539_v35 = vrot.slane %v538_v34, 4  ;;  %v551_v49 = vadd.f32 %v550_v47, %v548_v48  ;;  %v535_v48 = vld [vmem:[#allocation13] sm:$0x1] }
 0x1bf   :  { %1907 = vmatpush3.bf16.msra.mxu0 %v1904_v20  ;;  %v757_v20 = vld [vmem:[#allocation9 + $0x70] sm:$0xff] }
 0x1c0   :  { %v540_v36 = vadd.f32 %v539_v35, %v538_v34  ;;  %v552_v50 = vrot.slane %v551_v49, 4  ;;  %1909 = vmatprep.subr.bf16.mxu0 %v1908_v23  ;;  %v1940_v22 = vpack.c.bf16 %v758_v21, %v757_v20 }
 0x1c2   :  { %v541_v37 = vrot.slane %v540_v36, 2  ;;  %v553_v51 = vadd.f32 %v552_v50, %v551_v49 }
 0x1c3   :  { %1911 = vmatpush3.bf16.msra.mxu0 %v1908_v23  ;;  %v947_v23 = vld [vmem:[#allocation9 + $0x100] sm:$0xff] }
 0x1c4   :  { %v542_v38 = vadd.f32 %v541_v37, %v540_v36  ;;  %v554_v52 = vrot.slane %v553_v51, 2  ;;  %1913 = vmatprep.subr.bf16.mxu0 %v1912_v28  ;;  %v1944_v27 = vpack.c.bf16 %v948_v24, %v947_v23 }
 0x1c6   :  { %v543_v41 = vrot.slane %v542_v38, 1  ;;  %v555_v53 = vadd.f32 %v554_v52, %v553_v51 }
 0x1c8   :  { %v544_v43 = vadd.f32 %v543_v41, %v542_v38  ;;  %v556_v54 = vrot.slane %v555_v53, 1  ;;  %v709_v41 = vshrl.u32 %v708_v40, 7  ;;  %v954_v40 = vld [vmem:[#allocation9 + $0x138] sm:$0xff] }
 0x1ca   :  { %1563 = vmatmul.mubr.f32.vlgmr.msra.gmra.mrb[4].mxu1 %v544_v43  ;;  %v557_v56 = vadd.f32 %v556_v54, %v555_v53  ;;  %v2656_v43 = vsub.s32 0, %v709_v41 }
 0x1cb   :  { %1858 = vmatpush3.bf16.msra.mxu1 %v2558_v46  ;;  %1597 = vmatprep.mubr.msk.f32.mxu1 %vm2330_vm2, %v2328_v0 }
 0x1cc   :  { %1859 = vmatprep.subr.bf16.mxu1 %v2329_v45 }
 0x1cf   :  { %1861 = vmatpush3.bf16.msra.mxu1 %v2570_v55 }
 0x1d0   :  { %1862 = vmatprep.subr.bf16.mxu1 %v2329_v45 }
 0x1d3   :  { %1864 = vmatpush3.bf16.msra.mxu1 %v2574_v58 }
 0x1d4   :  { %1865 = vmatprep.subr.bf16.mxu1 %v2329_v45 }
 0x1d7   :  { %1867 = vmatpush3.bf16.msra.mxu1 %v2578_v61 }
 0x1d8   :  { %1868 = vmatprep.subr.bf16.mxu1 %v2329_v45 }
 0x1db   :  { %1870 = vmatpush3.bf16.msra.mxu1 %v2582_v1 }
 0x1dc   :  { %1871 = vmatprep.subr.bf16.mxu1 %v2329_v45 }
 0x1df   :  { %1873 = vmatpush3.bf16.msra.mxu1 %v2586_v4 }
 0x1e0   :  { %1874 = vmatprep.subr.bf16.mxu1 %v2329_v45 }
 0x1e3   :  { %1876 = vmatpush3.bf16.msra.mxu1 %v2590_v7 }
 0x1e4   :  { %1877 = vmatprep.subr.bf16.mxu1 %v2329_v45 }
 0x1e7   :  { %1879 = vmatpush3.bf16.msra.mxu1 %v2594_v10 }
 0x1e8   :  { %1976 = vmatprep.subr.bf16.mxu1 %v2329_v45 }
 0x1ea   :  { %1598 = vmatmul.mubr.f32.vlgmr.msra.gmra.mrb[6].mxu1 %v557_v56 }
 0x1eb   :  { %1978 = vmatpush3.bf16.msra.mxu1 %v2558_v46  ;;  %1746 = vmatprep.mubr.msk.f32.mxu1 %vm2330_vm2, %v2328_v0 }
 0x1ec   :  { %1979 = vmatprep.subr.bf16.mxu1 %v2329_v45 }
 0x1ef   :  { %1981 = vmatpush3.bf16.msra.mxu1 %v2570_v55 }
 0x1f0   :  { %1982 = vmatprep.subr.bf16.mxu1 %v2329_v45 }
 0x1f3   :  { %1984 = vmatpush3.bf16.msra.mxu1 %v2574_v58 }
 0x1f4   :  { %1985 = vmatprep.subr.bf16.mxu1 %v2329_v45 }
 0x1f7   :  { %1987 = vmatpush3.bf16.msra.mxu1 %v2578_v61 }
 0x1f8   :  { %1988 = vmatprep.subr.bf16.mxu1 %v2329_v45 }
 0x1fb   :  { %1990 = vmatpush3.bf16.msra.mxu1 %v2582_v1 }
 0x1fc   :  { %1991 = vmatprep.subr.bf16.mxu1 %v2329_v45 }
 0x1ff   :  { %1993 = vmatpush3.bf16.msra.mxu1 %v2586_v4 }
 0x200   :  { %1994 = vmatprep.subr.bf16.mxu1 %v2329_v45 }
 0x203   :  { %1996 = vmatpush3.bf16.msra.mxu1 %v2590_v7 }
 0x204   :  { %1997 = vmatprep.subr.bf16.mxu1 %v2329_v45 }
 0x207   :  { %1999 = vmatpush3.bf16.msra.mxu1 %v2594_v10 }
 0x208   :  { %2000 = vmatprep.subr.bf16.mxu1 %v2329_v45 }
 0x29d   :  { %v624_v29 = vpop.f32.mrb[4].mxu1 }
 0x29e   :  { %v1564_v30 = vpop.f32.mrb[5].mxu1  ;;  %v698_v33 = vmul.f32 0.001953125, %v624_v29  ;;  %v950_v29 = vld [vmem:[#allocation9 + $0x118] sm:$0xff] }
 0x2a0   :  { %v700_v35 = vmul.f32 %v698_v33, %v698_v33 }
 0x2bd   :  { %v694_v34 = vpop.f32.mrb[6].mxu1 }
 0x2be   :  { %v699_v36 = vmul.f32 0.001953125, %v694_v34  ;;  %v1599_v37 = vpop.f32.mrb[7].mxu1  ;;  %v951_v34 = vld [vmem:[#allocation9 + $0x120] sm:$0xff] }
 0x2c0   :  { %v701_v38 = vsub.f32 %v699_v36, %v700_v35  ;;  %v952_v35 = vld [vmem:[#allocation9 + $0x128] sm:$0xff] }
 0x2c1   :  { %v1952_v37 = vpack.c.bf16 %v952_v35, %v951_v34 }
 0x2c2   :  { %v702_v39 = vadd.f32 1e-05, %v701_v38 }
 0x2c4   :  { %2056 = vrsqrt.f32 %v702_v39  ;;  %v953_v39 = vld [vmem:[#allocation9 + $0x130] sm:$0xff] }
 0x2ce   :  { %v2057_v44 = vpop.eup %2056 }
 0x2cf   :  { %v704_v47 = vmul.f32 %v2057_v44, %v534_v42  ;;  %v1956_v42 = vpack.c.bf16 %v954_v40, %v953_v39  ;;  %v955_v44 = vld [vmem:[#allocation9 + $0x140] sm:$0xff] }
 0x2d1   :  { %v705_v49 = vmul.f32 %v704_v47, %v698_v33  ;;  %v711_v50 = vrot.slane %v704_v47, %v2656_v43  ;;  %v956_v47 = vld [vmem:[#allocation9 + $0x148] sm:$0xff] }
 0x2d3   :  { %v706_v51 = vsub.f32 %v535_v48, %v705_v49  ;;  %v713_v52 = vmul.f32 %v711_v50, %v2602_v26  ;;  %v714_v54 = vmul.f32 %v711_v50, %v2600_v25  ;;  %v715_v56 = vmul.f32 %v711_v50, %v2606_v31  ;;  %v747_v26 = vld [vmem:[#allocation9 + $0x20] sm:$0xff]  ;;  %v749_v31 = vld [vmem:[#allocation9 + $0x30] sm:$0xff] }
 0x2d4   :  { %v716_v60 = vmul.f32 %v711_v50, %v2608_v32  ;;  %v1920_v25 = vpack.c.bf16 %v748_v6, %v747_v26  ;;  %v1924_v9 = vpack.c.bf16 %v750_v8, %v749_v31  ;;  %v1960_v48 = vpack.c.bf16 %v956_v47, %v955_v44  ;;  %v957_v49 = vld [vmem:[#allocation9 + $0x150] sm:$0xff]  ;;  %v958_v50 = vld [vmem:[#allocation9 + $0x158] sm:$0xff]  ;;  %v1068_v47 = vld [vmem:[#allocation18] sm:$0x1] }
 0x2d5   :  { %v721_v53 = vrot.slane %v706_v51, %v2656_v43  ;;  %v1964_v51 = vpack.c.bf16 %v958_v50, %v957_v49 }
 0x2d7   :  { %v723_v62 = vadd.f32 %v721_v53, %v713_v52  ;;  %v724_v63 = vadd.f32 %v721_v53, %v714_v54  ;;  %v725_v2 = vadd.f32 %v721_v53, %v715_v56  ;;  %v726_v3 = vadd.f32 %v721_v53, %v716_v60  ;;  %v959_v52 = vld [vmem:[#allocation9 + $0x160] sm:$0xff]  ;;  %v960_v53 = vld [vmem:[#allocation9 + $0x168] sm:$0xff]  ;;  %v961_v56 = vld [vmem:[#allocation9 + $0x170] sm:$0xff] }
 0x2d8   :  { %v1968_v54 = vpack.c.bf16 %v960_v53, %v959_v52  ;;  %v1972_v59 = vpack.c.bf16 %v962_v57, %v961_v56 }
 0x2d9   :  { %731 = vst [vmem:[#allocation3 + $0x1] sm:$0xff] %v723_v62  ;;  %1632 = vmatprep.mubr.f32.mxu0 %v723_v62  ;;  %732 = vst [vmem:[#allocation3 + $0x9] sm:$0xff] %v724_v63 }
 0x2da   :  { %733 = vst [vmem:[#allocation3 + $0x19] sm:$0xff] %v725_v2  ;;  %734 = vst [vmem:[#allocation3 + $0x21] sm:$0xff] %v726_v3  ;;  %1633 = vmatmul.mubr.f32.vlgmr.msra.gmra.mrb[4].mxu0 %v724_v63 }
 0x2db   :  { %1915 = vmatpush3.bf16.msra.mxu0 %v1912_v28  ;;  %1635 = vmatprep.mubr.f32.mxu0 %v725_v2  ;;  %v949_v28 = vld [vmem:[#allocation9 + $0x110] sm:$0xff]  ;;  %v1299_v2 = vld [vmem:[#allocation15] ss:$0 sm:$0xff] }
 0x2dc   :  { %1917 = vmatprep.subr.bf16.mxu0 %v1916_v5  ;;  %v1948_v30 = vpack.c.bf16 %v950_v29, %v949_v28 }
 0x2de   :  { %1636 = vmatmul.mubr.f32.gmra.mrb[6].mxu0 %v726_v3 }
 0x2df   :  { %1919 = vmatpush3.bf16.msra.mxu0 %v1916_v5 }
 0x2e0   :  { %1921 = vmatprep.subr.bf16.mxu0 %v1920_v25  ;;  %v735_v32 = vld [vmem:[#allocation3] sm:$0xff]  ;;  %v736_v33 = vld [vmem:[#allocation3 + $0x8] sm:$0xff] }
 0x2e1   :  { %1670 = vmatprep.mubr.f32.mxu0 %v735_v32  ;;  %v737_v36 = vld [vmem:[#allocation3 + $0x18] sm:$0xff]  ;;  %v738_v38 = vld [vmem:[#allocation3 + $0x20] sm:$0xff]  ;;  %v740_v60 = vld [vmem:[#allocation3 + $0xa] sm:$0xff] }
 0x2e2   :  { %v739_v41 = vld [vmem:[#allocation3 + $0x2] sm:$0xff]  ;;  %v741_v62 = vld [vmem:[#allocation3 + $0x1a] sm:$0xff] }
 0x2e3   :  { %1923 = vmatpush3.bf16.msra.mxu0 %v1920_v25  ;;  %v742_v63 = vld [vmem:[#allocation3 + $0x22] sm:$0xff] }
 0x2e4   :  { %1925 = vmatprep.subr.bf16.mxu0 %v1924_v9 }
 0x2e7   :  { %1927 = vmatpush3.bf16.msra.mxu0 %v1924_v9 }
 0x2e8   :  { %1929 = vmatprep.subr.bf16.mxu0 %v1928_v13 }
 0x2eb   :  { %1931 = vmatpush3.bf16.msra.mxu0 %v1928_v13 }
 0x2ec   :  { %1933 = vmatprep.subr.bf16.mxu0 %v1932_v16 }
 0x2ef   :  { %1935 = vmatpush3.bf16.msra.mxu0 %v1932_v16 }
 0x2f0   :  { %1937 = vmatprep.subr.bf16.mxu0 %v1936_v19 }
 0x2f3   :  { %1939 = vmatpush3.bf16.msra.mxu0 %v1936_v19 }
 0x2f4   :  { %1941 = vmatprep.subr.bf16.mxu0 %v1940_v22 }
 0x2f7   :  { %1943 = vmatpush3.bf16.msra.mxu0 %v1940_v22 }
 0x2f8   :  { %1945 = vmatprep.subr.bf16.mxu0 %v1944_v27 }
 0x2fa   :  { %1671 = vmatmul.mubr.f32.vlgmr.msra.gmra.mrb[4].mxu0 %v736_v33 }
 0x2fb   :  { %1673 = vmatprep.mubr.f32.mxu0 %v737_v36  ;;  %1947 = vmatpush3.bf16.msra.mxu0 %v1944_v27 }
 0x2fc   :  { %1949 = vmatprep.subr.bf16.mxu0 %v1948_v30 }
 0x2fe   :  { %1674 = vmatmul.mubr.f32.gmra.mrb[6].mxu0 %v738_v38 }
 0x2ff   :  { %1951 = vmatpush3.bf16.msra.mxu0 %v1948_v30  ;;  %1708 = vmatprep.mubr.f32.mxu0 %v739_v41 }
 0x300   :  { %1953 = vmatprep.subr.bf16.mxu0 %v1952_v37 }
 0x303   :  { %1955 = vmatpush3.bf16.msra.mxu0 %v1952_v37 }
 0x304   :  { %1957 = vmatprep.subr.bf16.mxu0 %v1956_v42 }
 0x307   :  { %1959 = vmatpush3.bf16.msra.mxu0 %v1956_v42  ;;  %v1067_v42 = vld [vmem:[#allocation16] sm:$0x1] }
 0x308   :  { %1961 = vmatprep.subr.bf16.mxu0 %v1960_v48 }
 0x30b   :  { %1963 = vmatpush3.bf16.msra.mxu0 %v1960_v48 }
 0x30c   :  { %1965 = vmatprep.subr.bf16.mxu0 %v1964_v51 }
 0x30f   :  { %1967 = vmatpush3.bf16.msra.mxu0 %v1964_v51 }
 0x310   :  { %1969 = vmatprep.subr.bf16.mxu0 %v1968_v54 }
 0x313   :  { %1971 = vmatpush3.bf16.msra.mxu0 %v1968_v54 }
 0x314   :  { %1973 = vmatprep.subr.bf16.mxu0 %v1972_v59 }
 0x317   :  { %1975 = vmatpush3.bf16.msra.mxu0 %v1972_v59 }
 0x31a   :  { %1709 = vmatmul.mubr.f32.vlgmr.msra.gmra.mrb[4].mxu0 %v740_v60 }
 0x31b   :  { %1711 = vmatprep.mubr.f32.mxu0 %v741_v62 }
 0x31e   :  { %1712 = vmatmul.mubr.f32.gmra.mrb[6].mxu0 %v742_v63 }
 0x3ed   :  { %v1710_v3 = vpop.f32.mrb[4].mxu0 }
 0x3ee   :  { %v1060_v5 = vadd.f32 %v1710_v3, %v1299_v2  ;;  %v1029_v26 = vpop.f32.mrb[5].mxu0 }
 0x3ef   :  { %v1059_v6 = vadd.f32 %v1299_v2, %v1029_v26 }
 0x3f0   :  { %v2664_v25 = vmax.f32 %v1060_v5, 0.0 }
 0x3f1   :  { %v2666_v31 = vmax.f32 %v1059_v6, 0.0  ;;  %v1713_v8 = vpop.f32.mrb[6].mxu0 }
 0x3f2   :  { %v1039_v32 = vpop.f32.mrb[7].mxu0  ;;  %v1062_v9 = vadd.f32 %v1713_v8, %v1299_v2  ;;  %v1079_v21 = vmul.f32 %v2664_v25, %v2664_v25 }
 0x3f3   :  { %v1061_v11 = vadd.f32 %v1299_v2, %v1039_v32  ;;  %v1069_v12 = vadd.f32 %v2664_v25, %v2666_v31  ;;  %v1078_v22 = vmul.f32 %v2666_v31, %v2666_v31 }
 0x3f4   :  { %v1066_v14 = vmax.f32 %v1062_v9, 0.0 }
 0x3f5   :  { %v1065_v13 = vmax.f32 %v1061_v11, 0.0  ;;  %v1082_v28 = vadd.f32 %v1079_v21, %v1078_v22 }
 0x3f6   :  { %v1081_v30 = vmul.f32 %v1066_v14, %v1066_v14 }
 0x3f7   :  { %v1070_v15 = vadd.f32 %v1069_v12, %v1065_v13  ;;  %v1080_v24 = vmul.f32 %v1065_v13, %v1065_v13 }
 0x3f9   :  { %v1071_v16 = vadd.f32 %v1070_v15, %v1066_v14  ;;  %v1083_v29 = vadd.f32 %v1082_v28, %v1080_v24 }
 0x3fb   :  { %v1072_v17 = vrot.slane %v1071_v16, 4  ;;  %v1084_v33 = vadd.f32 %v1083_v29, %v1081_v30 }
 0x3fd   :  { %v1073_v18 = vadd.f32 %v1072_v17, %v1071_v16  ;;  %v1085_v34 = vrot.slane %v1084_v33, 4 }
 0x3ff   :  { %v1074_v19 = vrot.slane %v1073_v18, 2 }
 0x401   :  { %v1075_v20 = vadd.f32 %v1074_v19, %v1073_v18 }
 0x403   :  { %v1076_v23 = vrot.slane %v1075_v20, 1 }
 0x405   :  { %v1077_v27 = vadd.f32 %v1076_v23, %v1075_v20 }
 0x407   :  { %1747 = vmatmul.mubr.f32.vlgmr.msra.gmra.mrb[8].mxu1 %v1077_v27 }
 0x408   :  { %2002 = vmatpush3.bf16.msra.mxu1 %v2558_v46  ;;  %1781 = vmatprep.mubr.msk.f32.mxu1 %vm2330_vm2, %v2328_v0  ;;  %v1086_v46 = vadd.f32 %v1085_v34, %v1084_v33 }
 0x409   :  { %2003 = vmatprep.subr.bf16.mxu1 %v2329_v45 }
 0x40a   :  { %v1087_v0 = vrot.slane %v1086_v46, 2 }
 0x40c   :  { %2005 = vmatpush3.bf16.msra.mxu1 %v2570_v55  ;;  %v1088_v55 = vadd.f32 %v1087_v0, %v1086_v46 }
 0x40d   :  { %2006 = vmatprep.subr.bf16.mxu1 %v2329_v45 }
 0x410   :  { %2008 = vmatpush3.bf16.msra.mxu1 %v2574_v58  ;;  %v1089_v58 = vrot.slane %v1088_v55, 1 }
 0x411   :  { %2009 = vmatprep.subr.bf16.mxu1 %v2329_v45 }
 0x414   :  { %2011 = vmatpush3.bf16.msra.mxu1 %v2578_v61  ;;  %v1090_v61 = vadd.f32 %v1089_v58, %v1088_v55 }
 0x415   :  { %2012 = vmatprep.subr.bf16.mxu1 %v2329_v45 }
 0x418   :  { %2014 = vmatpush3.bf16.msra.mxu1 %v2582_v1 }
 0x419   :  { %2015 = vmatprep.subr.bf16.mxu1 %v2329_v45 }
 0x41c   :  { %2017 = vmatpush3.bf16.msra.mxu1 %v2586_v4 }
 0x41d   :  { %2018 = vmatprep.subr.bf16.mxu1 %v2329_v45 }
 0x420   :  { %2020 = vmatpush3.bf16.msra.mxu1 %v2590_v7 }
 0x421   :  { %2021 = vmatprep.subr.bf16.mxu1 %v2329_v45 }
 0x424   :  { %2023 = vmatpush3.bf16.msra.mxu1 %v2594_v10 }
 0x427   :  { %1782 = vmatmul.mubr.f32.vlgmr.msra.gmra.mrb[10].mxu1 %v1090_v61 }
 0x4da   :  { %v1157_v35 = vpop.f32.mrb[8].mxu1 }
 0x4db   :  { %v1748_v36 = vpop.f32.mrb[9].mxu1  ;;  %v1231_v1 = vmul.f32 0.001953125, %v1157_v35 }
 0x4dd   :  { %v1233_v38 = vmul.f32 %v1231_v1, %v1231_v1 }
 0x4fa   :  { %v1227_v37 = vpop.f32.mrb[10].mxu1 }
 0x4fb   :  { %v1232_v39 = vmul.f32 0.001953125, %v1227_v37  ;;  %v1783_v40 = vpop.f32.mrb[11].mxu1 }
 0x4fd   :  { %v1234_v4 = vsub.f32 %v1232_v39, %v1233_v38 }
 0x4ff   :  { %v1235_v41 = vadd.f32 1e-05, %v1234_v4 }
 0x501   :  { %2058 = vrsqrt.f32 %v1235_v41 }
 0x50b   :  { %v2059_v44 = vpop.eup %2058 }
 0x50c   :  { %v1237_v7 = vmul.f32 %v2059_v44, %v1067_v42 }
 0x50e   :  { %v1238_v45 = vmul.f32 %v1237_v7, %v1231_v1  ;;  %v1244_v48 = vrot.slane %v1237_v7, %v2656_v43 }
 0x510   :  { %v1239_v10 = vsub.f32 %v1068_v47, %v1238_v45  ;;  %v1246_v49 = vmul.f32 %v1244_v48, %v2666_v31  ;;  %v1247_v50 = vmul.f32 %v1244_v48, %v2664_v25  ;;  %v1248_v51 = vmul.f32 %v1244_v48, %v1065_v13 }
 0x511   :  { %v1249_v52 = vmul.f32 %v1244_v48, %v1066_v14 }
 0x512   :  { %v1254_v53 = vrot.slane %v1239_v10, %v2656_v43 }
 0x514   :  { %v1256_v54 = vadd.f32 %v1254_v53, %v1246_v49  ;;  %v1257_v56 = vadd.f32 %v1254_v53, %v1247_v50  ;;  %v1258_v57 = vadd.f32 %v1254_v53, %v1248_v51  ;;  %v1259_v59 = vadd.f32 %v1254_v53, %v1249_v52 }
 0x516   :  { %1260 = vst [vmem:[#allocation21] sm:$0xff] %v1256_v54  ;;  %1261 = vst [vmem:[#allocation21 + $0x8] sm:$0xff] %v1257_v56 }
 0x517   :  { %1262 = vst [vmem:[#allocation21 + $0x10] sm:$0xff] %v1258_v57  ;;  %1263 = vst [vmem:[#allocation21 + $0x18] sm:$0xff] %v1259_v59 }
 0x518   :  { %2291 = shalt.err (!%p2288_p0)
}
 0x519   :  { %s2292_s16 = scalar_lea.hbm %s2720_s10, 512 }
 0x51a   :  { %p2293_p1 = scmp.ne.s32.totalorder %s2720_s10, %s2292_s16  ;;  %p2296_p2 = scmp.lt.u32.totalorder %s2292_s16, %s2720_s10 }
 0x51c   :  { %p2298_p3 = pnand %p2296_p2, %p2293_p1 }
 0x51e   :  { %2301 = shalt.err (!%p2298_p3)
}
 0x51f   :  { %1275 = dma.vmem_to_hbm [thread:$0]  %s1270_s4, 512, %s2720_s10, [#allocation6], %s2318_s25, %s2318_s25, %s2319_s26  }
 0x520   :  { %2314 = dma.done.wait [#allocation6], 512  }
 0x521   :  { %2315 = vsyncadd [#allocation6], 4294966784 }
 0x522   :  { %1279 = vsyncpa [#allocation5], 1 }
 0x523   :  { %1280 = vsyncpa [#allocation8], 1 }
 0x524   :  { %1281 = vsyncpa [#allocation11], 1 }
 0x525   :  { %1282 = vsyncpa [#allocation14], 1 }
 0x526   :  { %1283 = vsyncpa [#allocation17], 1 }
 0x527   :  { %1284 = vsyncpa [#allocation20], 1 }
 0x528   :  { %1285 = vsyncpa [#allocation6], 1 }

</bundles_post_ra>
